<compile_context>
chip_gen: v7x
topology: tpu7x:2x2x1
jax: 0.10.0
libtpu: 0.0.40
codegen_flags: <defaults>
</compile_context>

<pallas_src>
import jax
import jax.numpy as jnp
from jax.experimental import pallas as pl
from jax.experimental.pallas import tpu as pltpu


def sgc_kernel(x_ref, k_ref, b_ref, o_ref):
    # x_ref: (TB, K_in)     flattened (batch*time) rows
    # k_ref: (K_in, TN)     column block of the fused adjacency x weight operator
    # b_ref: (1, TN)        f32 bias tiled over nodes
    # o_ref: (TB, TN)       lane-dense output block (unmasked vector stores)
    y = jnp.dot(x_ref[...], k_ref[...], preferred_element_type=jnp.float32)
    y = y + b_ref[...]                                   # bias, free VPU filler
    o_ref[...] = jnp.maximum(y, 0.0).astype(o_ref.dtype)  # ReLU


def _vmem_capacity_bytes():
    try:
        return int(pltpu.get_tpu_info().vmem_capacity_bytes)
    except Exception:
        return 64 * 1024 * 1024  # conservative default: v7x per-TensorCore VMEM


def _choose_col_block(k_out_pad, cap=1024):
    """Largest multiple-of-128 divisor of k_out_pad that is <= cap (lane-dense)."""
    cap = max(128, min(cap, k_out_pad))
    best = 128
    d = 128
    while d <= cap:
        if k_out_pad % d == 0:
            best = d
        d += 128
    return best


def _choose_row_block(m, cap):
    """Pick TB rows per grid step.

    Prefers a sublane-aligned (multiple of 8) divisor of M giving >= 2 grid steps:
    no input padding, no output re-copy, and both v7x TensorCores get work.
    Returns (TB, needs_pad).
    """
    cap = max(8, min(cap, m))
    best = 0
    d = 8
    while d <= cap:
        if m % d == 0 and m // d >= 2:
            best = d
        d += 8
    if best:
        return best, False
    if m <= cap:
        return m, False          # tiny problem: single full-width row block
    return cap, True             # fallback: padded row blocks (rare, e.g. prime M)


def spatial_graph_conv(x, adj, weight, bias, *, compute_dtype=None):
    """x: (B, T, N, C_in); adj: (N, N); weight: (C_out, C_in); bias: (C_out,)."""
    B, T, N, C_in = x.shape
    C_out = weight.shape[0]
    M = B * T
    K_in = N * C_in
    K_out = N * C_out

    cdtype = jnp.dtype(compute_dtype) if compute_dtype is not None else x.dtype
    out_dtype = x.dtype
    c_it = jnp.dtype(cdtype).itemsize
    o_it = jnp.dtype(out_dtype).itemsize

    # Fused operator: Kmat[n*C_in + c, m*C_out + o] = adj[n, m] * W[o, c]
    # (built once in plain JAX in f32; the Kronecker fusion of the two matmuls).
    kmat = jnp.einsum(
        "nm,oc->ncmo", adj.astype(jnp.float32), weight.astype(jnp.float32)
    ).reshape(K_in, K_out)
    # bias tiled so that bias_tile[m*C_out + o] = bias[o]; kept in f32 (post-accum).
    bias_tile = jnp.tile(bias.astype(jnp.float32), N).reshape(1, K_out)

    # Lane-align output columns -> unmasked vector stores on every row block.
    K_out_pad = ((K_out + 127) // 128) * 128
    if K_out_pad != K_out:
        kmat = jnp.pad(kmat, ((0, 0), (0, K_out_pad - K_out)))
        bias_tile = jnp.pad(bias_tile, ((0, 0), (0, K_out_pad - K_out)))
    kmat = kmat.astype(cdtype)

    x_flat = x.reshape(M, K_in).astype(cdtype)

    # --- tiling derived from the actual VMEM budget (generation-aware) ----------
    TN = _choose_col_block(K_out_pad)
    vmem_cap = _vmem_capacity_bytes()
    budget = vmem_cap // 2                       # headroom for compiler scratch
    fixed = 2 * K_in * TN * c_it + 2 * TN * 4    # kmat + bias blocks
    per_row = 2 * K_in * c_it + 2 * TN * o_it    # double-buffered x + out blocks
    tb_cap = (budget - fixed) // per_row if budget > fixed else 8
    tb_cap = max(8, min(int(tb_cap), 4096))
    tb_cap = (tb_cap // 8) * 8
    TB, needs_pad = _choose_row_block(M, tb_cap)

    if needs_pad:
        M_pad = ((M + TB - 1) // TB) * TB
        x_flat = jnp.pad(x_flat, ((0, M_pad - M), (0, 0)))
    else:
        M_pad = M

    row_steps = M_pad // TB
    col_steps = K_out_pad // TN

    need = (2 * TB * K_in * c_it + 2 * TB * TN * o_it
            + (1 if col_steps == 1 else 2) * K_in * TN * c_it + 2 * TN * 4)
    vmem_limit = int(min(vmem_cap * 3 // 4, max(4 * need, 32 * 1024 * 1024)))

    cost = pl.CostEstimate(
        flops=2 * M_pad * K_in * K_out_pad,
        transcendentals=0,
        bytes_accessed=(M_pad * K_in * c_it + K_in * K_out_pad * c_it
                        + K_out_pad * 4 + M_pad * K_out_pad * o_it),
    )

    def _run(single_buffer_const):
        # Constant-index operator blocks don't need double-buffering.
        const_kw = {"pipeline_mode": pl.Buffered(1)} if single_buffer_const else {}
        return pl.pallas_call(
            sgc_kernel,
            out_shape=jax.ShapeDtypeStruct((M_pad, K_out_pad), out_dtype),
            grid=(row_steps, col_steps),
            in_specs=[
                pl.BlockSpec((TB, K_in), lambda i, j: (i, 0)),
                pl.BlockSpec((K_in, TN), lambda i, j: (0, j), **const_kw),
                pl.BlockSpec((1, TN), lambda i, j: (0, j), **const_kw),
            ],
            out_specs=pl.BlockSpec((TB, TN), lambda i, j: (i, j)),
            compiler_params=pltpu.CompilerParams(
                dimension_semantics=("parallel", "parallel"),
                vmem_limit_bytes=vmem_limit,
            ),
            cost_estimate=cost,
        )(x_flat, kmat, bias_tile)

    if col_steps == 1:
        try:
            out = _run(True)
        except Exception:  # pipeline_mode support differs across jax versions
            out = _run(False)
    else:
        out = _run(False)

    if M_pad != M or K_out_pad != K_out:
        out = out[:M, :K_out]
    return out.reshape(B, T, N, C_out)


def reference(x, adj, weight, bias):
    # pure-JAX reference mirroring the PyTorch module exactly
    xc = jnp.transpose(x, (0, 3, 1, 2))                        # (B, C_in, T, N)
    xg = jnp.einsum("bctn,nm->bctm", xc, adj)                  # (B, C_in, T, N)
    y = jnp.einsum("bctn,oc->botn", xg, weight) + bias[None, :, None, None]
    return jax.nn.relu(jnp.transpose(y, (0, 2, 3, 1)))         # (B, T, N, C_out)


if __name__ == "__main__":
    B, T, N, C_in, C_out = 2, 8, 16, 4, 8
    key = jax.random.PRNGKey(0)
    kx, ka, kw, kb = jax.random.split(key, 4)

    x = jax.random.normal(kx, (B, T, N, C_in), dtype=jnp.float32)
    # symmetric normalized-ish adjacency (deterministic, synthetic)
    a = jax.random.uniform(ka, (N, N), dtype=jnp.float32)
    adj = (a + a.T) / (2.0 * N)
    # Conv2d(C_in, C_out, 1) parameters: weight (C_out, C_in), bias (C_out,)
    weight = jax.random.normal(kw, (C_out, C_in), dtype=jnp.float32) * 0.5
    bias = jax.random.normal(kb, (C_out,), dtype=jnp.float32) * 0.1

    out = spatial_graph_conv(x, adj, weight, bias)
    out = jax.block_until_ready(out)

    ref = reference(x, adj, weight, bias)
    assert out.shape == (B, T, N, C_out)
    assert jnp.allclose(out, ref, atol=1e-5, rtol=1e-5), "mismatch vs reference"
    print("KERNEL_OK")
</pallas_src>

<mosaic_0001>
module attributes {stable_mosaic.version = 11 : i64} {
  func.func @sgc_kernel(%arg0: i32, %arg1: i32, %arg2: memref<8x64xf32, #tpu.memory_space<vmem>>, %arg3: memref<64x128xf32, #tpu.memory_space<vmem>>, %arg4: memref<1x128xf32, #tpu.memory_space<vmem>>, %arg5: memref<8x128xf32, #tpu.memory_space<vmem>>) attributes {dimension_semantics = [#tpu.dimension_semantics<parallel>, #tpu.dimension_semantics<parallel>], iteration_bounds = array<i64: 2, 1>, scalar_prefetch = 0 : i64, scratch_operands = 0 : i64, tpu.core_type = #tpu.core_type<tc>, window_params = [{transform_indices = @transform_0, window_bounds = array<i64: 8, 64>}, {pipeline_mode = #tpu.pipeline_mode<synchronous>, transform_indices = @transform_1, window_bounds = array<i64: 64, 128>}, {pipeline_mode = #tpu.pipeline_mode<synchronous>, transform_indices = @transform_2, window_bounds = array<i64: 1, 128>}, {transform_indices = @transform_3, window_bounds = array<i64: 8, 128>}]} {
    %c0 = arith.constant 0 : index
    %c0_0 = arith.constant 0 : index
    %0 = vector.load %arg2[%c0, %c0_0] : memref<8x64xf32, #tpu.memory_space<vmem>>, vector<8x64xf32>
    %c0_1 = arith.constant 0 : index
    %c0_2 = arith.constant 0 : index
    %1 = vector.load %arg3[%c0_1, %c0_2] : memref<64x128xf32, #tpu.memory_space<vmem>>, vector<64x128xf32>
    %cst = arith.constant dense<0.000000e+00> : vector<8x128xf32>
    %2 = tpu.matmul %0, %1, %cst {dimension_numbers = #tpu.dot_dimension_numbers<[1], [0], [0], [1], [0, 0, 1, 1], [], []>} : vector<8x64xf32>, vector<64x128xf32>, vector<8x128xf32> -> vector<8x128xf32>
    %c0_3 = arith.constant 0 : index
    %c0_4 = arith.constant 0 : index
    %3 = vector.load %arg4[%c0_3, %c0_4] : memref<1x128xf32, #tpu.memory_space<vmem>>, vector<1x128xf32>
    %4 = vector.broadcast %3 : vector<1x128xf32> to vector<8x128xf32>
    %5 = arith.addf %2, %4 : vector<8x128xf32>
    %cst_5 = arith.constant 0.000000e+00 : f32
    %6 = vector.broadcast %cst_5 : f32 to vector<8x128xf32>
    %7 = arith.maximumf %5, %6 : vector<8x128xf32>
    %c0_6 = arith.constant 0 : index
    %c0_7 = arith.constant 0 : index
    %8 = vector.load %arg5[%c0_6, %c0_7] : memref<8x128xf32, #tpu.memory_space<vmem>>, vector<8x128xf32>
    tpu.vector_store %arg5[%c0_6, %c0_7], %7 {strides = array<i32>} : memref<8x128xf32, #tpu.memory_space<vmem>>, vector<8x128xf32>,
    return
  }
  func.func @transform_0(%arg0: i32, %arg1: i32) -> (i32, i32) {
    %c0_i32 = arith.constant 0 : i32
    %c0_i32_0 = arith.constant 0 : i32
    return %arg0, %c0_i32 : i32, i32
  }
  func.func @transform_1(%arg0: i32, %arg1: i32) -> (i32, i32) {
    %c0_i32 = arith.constant 0 : i32
    %c0_i32_0 = arith.constant 0 : i32
    return %c0_i32, %arg1 : i32, i32
  }
  func.func @transform_2(%arg0: i32, %arg1: i32) -> (i32, i32) {
    %c0_i32 = arith.constant 0 : i32
    %c0_i32_0 = arith.constant 0 : i32
    return %c0_i32, %arg1 : i32, i32
  }
  func.func @transform_3(%arg0: i32, %arg1: i32) -> (i32, i32) {
    %c0_i32 = arith.constant 0 : i32
    return %arg0, %arg1 : i32, i32
  }
}

module attributes {stable_mosaic.version = 11 : i64} {
  func.func @sgc_kernel(%arg0: i32, %arg1: i32, %arg2: memref<8x64xf32, #tpu.memory_space<vmem>>, %arg3: memref<64x128xf32, #tpu.memory_space<vmem>>, %arg4: memref<1x128xf32, #tpu.memory_space<vmem>>, %arg5: memref<8x128xf32, #tpu.memory_space<vmem>>) attributes {dimension_semantics = [#tpu.dimension_semantics<parallel>, #tpu.dimension_semantics<parallel>], iteration_bounds = array<i64: 2, 1>, scalar_prefetch = 0 : i64, scratch_operands = 0 : i64, tpu.core_type = #tpu.core_type<tc>, window_params = [{transform_indices = @transform_0, window_bounds = array<i64: 8, 64>}, {transform_indices = @transform_1, window_bounds = array<i64: 64, 128>}, {transform_indices = @transform_2, window_bounds = array<i64: 1, 128>}, {transform_indices = @transform_3, window_bounds = array<i64: 8, 128>}]} {
    %c0 = arith.constant 0 : index
    %c0_0 = arith.constant 0 : index
    %0 = vector.load %arg2[%c0, %c0_0] : memref<8x64xf32, #tpu.memory_space<vmem>>, vector<8x64xf32>
    %c0_1 = arith.constant 0 : index
    %c0_2 = arith.constant 0 : index
    %1 = vector.load %arg3[%c0_1, %c0_2] : memref<64x128xf32, #tpu.memory_space<vmem>>, vector<64x128xf32>
    %cst = arith.constant dense<0.000000e+00> : vector<8x128xf32>
    %2 = tpu.matmul %0, %1, %cst {dimension_numbers = #tpu.dot_dimension_numbers<[1], [0], [0], [1], [0, 0, 1, 1], [], []>} : vector<8x64xf32>, vector<64x128xf32>, vector<8x128xf32> -> vector<8x128xf32>
    %c0_3 = arith.constant 0 : index
    %c0_4 = arith.constant 0 : index
    %3 = vector.load %arg4[%c0_3, %c0_4] : memref<1x128xf32, #tpu.memory_space<vmem>>, vector<1x128xf32>
    %4 = vector.broadcast %3 : vector<1x128xf32> to vector<8x128xf32>
    %5 = arith.addf %2, %4 : vector<8x128xf32>
    %cst_5 = arith.constant 0.000000e+00 : f32
    %6 = vector.broadcast %cst_5 : f32 to vector<8x128xf32>
    %7 = arith.maximumf %5, %6 : vector<8x128xf32>
    %c0_6 = arith.constant 0 : index
    %c0_7 = arith.constant 0 : index
    %8 = vector.load %arg5[%c0_6, %c0_7] : memref<8x128xf32, #tpu.memory_space<vmem>>, vector<8x128xf32>
    tpu.vector_store %arg5[%c0_6, %c0_7], %7 {strides = array<i32>} : memref<8x128xf32, #tpu.memory_space<vmem>>, vector<8x128xf32>,
    return
  }
  func.func @transform_0(%arg0: i32, %arg1: i32) -> (i32, i32) {
    %c0_i32 = arith.constant 0 : i32
    %c0_i32_0 = arith.constant 0 : i32
    return %arg0, %c0_i32 : i32, i32
  }
  func.func @transform_1(%arg0: i32, %arg1: i32) -> (i32, i32) {
    %c0_i32 = arith.constant 0 : i32
    %c0_i32_0 = arith.constant 0 : i32
    return %c0_i32, %arg1 : i32, i32
  }
  func.func @transform_2(%arg0: i32, %arg1: i32) -> (i32, i32) {
    %c0_i32 = arith.constant 0 : i32
    %c0_i32_0 = arith.constant 0 : i32
    return %c0_i32, %arg1 : i32, i32
  }
  func.func @transform_3(%arg0: i32, %arg1: i32) -> (i32, i32) {
    %c0_i32 = arith.constant 0 : i32
    return %arg0, %arg1 : i32, i32
  }
}

</mosaic_0001>

<bundles_post_ra>
// kernel: tpu_custom_call.1
= control target key start
LH: loop header
LB: loop body
LE: loop exit
PB: predicated region body
PF: predicated region fallthrough
CT: control target
= control target key end

     0   :  { %8 = vsyncpa [#allocation3], 0  ;;  %s977_s0 = inlined_call_operand.hbm [shape: f32[16,64], index: 0, kind: input, shape index: {}]   ;;  %s978_s1 = inlined_call_operand.hbm [shape: f32[64,128], index: 1, kind: input, shape index: {}]   ;;  %s979_s2 = inlined_call_operand.vmem [shape: f32[1,128], index: 2, kind: input, shape index: {}]   ;;  %s980_s3 = inlined_call_operand.hbm [shape: f32[16,128], index: 3, kind: output, shape index: {}]  }
   0x1   :  { %10 = vsyncpa [#allocation3 + $0x1], 0 }
   0x2   :  { %11 = vsyncpa [#allocation6], 0 }
   0x3   :  { %12 = vsyncpa [#allocation4], 0 }
   0x4   :  { %14 = vsyncpa [#allocation4 + $0x1], 0  ;;  %s756_s12 = smov 0   ;;  %s758_s13 = smov 0  }
   0x5   :  { %s760_s14 = smov 0   ;;  %s762_s15 = smov 0  }
   0x6   :  { %s764_s16 = smov 0   ;;  %s766_s17 = smov 0  }
   0x7 LB: > { %s446_s18 = sadd.s32 4294967295, %s726_s17   ;;  %s447_s19 = sadd.s32 4294967294, %s726_s17   ;;  %s726_s17 = sphi %s766_s17, %s20_s17   ;;  %s722_s16 = sphi %s764_s16, %s1004_s16   ;;  %s718_s15 = sphi %s762_s15, %s1003_s15   ;;  %s714_s14 = sphi %s760_s14, %s1002_s14   ;;  %s710_s13 = sphi %s758_s13, %s1001_s13   ;;  %s706_s12 = sphi %s756_s12, %s1000_s12  }
   0x8   : > { %p52_p0 = scmp.ne.s32.totalorder %s710_s13, %s706_s12  ;;  %p790_p1 = scmp.eq.s32.totalorder %s446_s18, 0 }
   0x9   : > { %p794_p2 = scmp.eq.s32.totalorder %s446_s18, 1  ;;  %p136_p3 = scmp.eq.s32.totalorder %s447_s19, 1 }
   0xa   : > { %s985_s20 = scalar_select %p790_p1, 1, 0 }
   0xb   : > { %s986_s21 = scalar_select %p794_p2, 1, 0 }
   0xc   : > { %p800_p4 = por %p790_p1, %p52_p0  ;;  %p448_p5 = scmp.ge.s32.totalorder %s726_s17, 1 }
   0xd   : > { %p805_p6 = por %p136_p3, %p52_p0  ;;  %p143_p7 = scmp.lt.s32.totalorder %s726_s17, 3 }
   0xe   : > { %s987_s22 = scalar_select %p800_p4, 1, 0 }
   0xf   : > { %s988_s23 = scalar_select %p805_p6, 1, 0 }
  0x10   : > { %p810_p8 = pnand %p448_p5, %p143_p7  ;;  %s728_s25 = smov [#allocation5]  }
  0x11   : > { %s157_s26 = sshll.u32 %s728_s25, 4  ;;  %s32_s28 = sadd.s32 1, %s722_s16  ;;  %s158_s26 = int_to_ptr.vmem [resolvable:$true] %s157_s26 }
  0x12   : > { %s989_s24 = scalar_select %p810_p8, 1, 0 }
  0x13   : > { %p512_p9 = pneg %p810_p8  ;;  %s582_s4 = scalar_lea.hbm %s978_s1, 1024 }
  0x14   : > { %p583_p12 = scmp.ne.s32.totalorder %s978_s1, %s582_s4  ;;  %p589_p5 = scmp.lt.u32.totalorder %s582_s4, %s978_s1 }
  0x15   : > { %p819_p11 = pnand %p512_p9, %p790_p1 }
  0x17   : > { %p584_p13 = pneg %p819_p11 }
  0x19   : > { %p585_p0 = pnand %p584_p13, %p583_p12 }
  0x1b   : > { %p586_p3 = pneg %p585_p0 }
  0x1d   : > { %p591_p7 = pnand %p589_p5, %p586_p3 }
  0x1f   : > { %594 = shalt.err (!%p591_p7)
}
  0x20   : > { %s595_s9 = scalar_lea.vmem %s158_s26, 1024  ;;  %p603_p1 = scmp.lt.s32.totalorder %s158_s26, %s158_s26 }
  0x21   : > { %p596_p9 = scmp.ne.s32.totalorder %s158_s26, %s595_s9  ;;  %p604_p4 = scmp.lt.s32.totalorder %s595_s9, %s595_s9 }
  0x23   : > { %p598_p10 = pnand %p596_p9, %p584_p13  ;;  %p605_p8 = por %p604_p4, %p603_p1 }
  0x25   : > { %p599_p6 = pneg %p598_p10 }
  0x27   : > { %p606_p2 = pnand %p605_p8, %p599_p6 }
  0x29   : > { %609 = shalt.err (!%p606_p2)
}
  0x2a   : > { %s729_s10 = smov 128   ;;  %s730_s11 = smov 8  }
  0x2b   : > { %515 = dma.hbm_to_vmem [thread:$0]  (!%p819_p11), %s978_s1, 1024, %s158_s26, [#allocation6], %s729_s10, %s729_s10, %s730_s11  }
  0x2c   : > { %p34_p1 = scmp.ge.s32.totalorder %s32_s28, 2  ;;  %s39_s25 = sadd.s32 1, %s714_s14 }
  0x2d   : > { %p46_p2 = scmp.ne.s32.totalorder %s714_s14, %s710_s13  ;;  %p47_p4 = scmp.eq.s32.totalorder %s726_s17, 0 }
  0x2e   : > { %s1006_s28 = smov (%p34_p1, %s32_s28), 0  ;;  %p992_p8 = scmp.ne.s32.totalorder %s986_s21, 0 }
  0x2f   : > { %p846_p6 = por %p47_p4, %p46_p2  ;;  %s36_s27 = ssub.s32 %s722_s16, %s1006_s28 }
  0x30   : > { %p852_p10 = por %p992_p8, %p46_p2  ;;  %p525_p12 = scmp.lt.s32.totalorder %s726_s17, 2 }
  0x31   : > { %p37_p11 = scmp.eq.s32.totalorder %s36_s27, 0  ;;  %s177_s26 = sand.u32 1, %s714_s14  }
  0x32   : > { %s452_s4 = sshll.u32 %s177_s26, 3  ;;  %s453_s6 = sshll.u32 %s722_s16, 7 }
  0x33   : > { %s861_s5 = scalar_select %p37_p11, %s714_s14, %s39_s25  }
  0x34   : > { %s867_s9 = scalar_lea.hbm %s977_s0, %s453_s6  ;;  %s181_s21 = scalar_lea.vmem [#allocation2], %s452_s4 }
  0x35   : > { %s188_s10 = sshll.u32 %s181_s21, 4  ;;  %p873_p13 = pnand %p525_p12, %p846_p6  ;;  %s869_s10 = int_to_ptr.vmem [resolvable:$true] %s188_s10 }
  0x36   : > { %s178_s18 = scalar_lea.sflag [#allocation3], %s177_s26  ;;  %s610_s19 = scalar_lea.hbm %s867_s9, 128 }
  0x37   : > { %p611_p0 = scmp.ne.s32.totalorder %s867_s9, %s610_s19  ;;  %p612_p3 = pneg %p873_p13 }
  0x38   : > { %s615_s4 = scalar_lea.hbm %s977_s0, 256  ;;  %p616_p9 = scmp.lt.u32.totalorder %s867_s9, %s977_s0 }
  0x39   : > { %p613_p5 = pnand %p612_p3, %p611_p0  ;;  %p617_p1 = scmp.lt.u32.totalorder %s615_s4, %s610_s19 }
  0x3a   : > { %p619_p4 = scmp.lt.u32.totalorder %s610_s19, %s867_s9 }
  0x3b   : > { %p614_p7 = pneg %p613_p5  ;;  %p618_p2 = por %p617_p1, %p616_p9 }
  0x3d   : > { %p620_p6 = por %p619_p4, %p618_p2 }
  0x3f   : > { %p621_p8 = pnand %p620_p6, %p614_p7 }
  0x41   : > { %624 = shalt.err (!%p621_p8)
}
  0x42   : > { %s625_s26 = scalar_lea.vmem %s869_s10, 128  ;;  %s731_s7 = smov [#allocation2]  }
  0x43   : > { %p626_p12 = scmp.ne.s32.totalorder %s869_s10, %s625_s26  ;;  %s630_s8 = sshll.u32 %s731_s7, 4  ;;  %s631_s8 = int_to_ptr.vmem [resolvable:$false] %s630_s8 }
  0x44   : > { %s632_s21 = scalar_lea.vmem %s631_s8, 256  ;;  %p633_p5 = scmp.lt.s32.totalorder %s869_s10, %s631_s8 }
  0x45   : > { %p628_p11 = pnand %p626_p12, %p612_p3  ;;  %p634_p9 = scmp.lt.s32.totalorder %s632_s21, %s625_s26 }
  0x47   : > { %p629_p0 = pneg %p628_p11  ;;  %p635_p1 = por %p634_p9, %p633_p5 }
  0x49   : > { %p636_p2 = pnand %p635_p1, %p629_p0 }
  0x4b   : > { %639 = shalt.err (!%p636_p2)
}
  0x4c   : > { %519 = dma.hbm_to_vmem [thread:$0]  (!%p873_p13), %s867_s9, 128, %s869_s10, %s178_s18  }
  0x4d   : > { %p995_p7 = scmp.ne.s32.totalorder %s989_s24, 0 }
  0x4e   : > { %s905_s19 = sand.u32 (!%p995_p7), 1, %s710_s13   ;;  %p996_p3 = scmp.ne.s32.totalorder (!%p995_p7), %s987_s22, 0 }
  0x4f   : > { %197 = sbr.rel (%p995_p7) target bundleno = 339 (0x153), region = 32  ;;  %s455_s25 = sshll.u32 (!%p995_p7), %s905_s19, 3 }
  0x50   : > { %s200_s27 = scalar_lea.sflag (!%p995_p7), [#allocation3], %s905_s19  ;;  %s203_s4 = scalar_lea.vmem (!%p995_p7), [#allocation2], %s455_s25 }
  0x56   : > { %693 = dma.done.wait (%p996_p3), %s200_s27, 128  }
  0x57   : > { %695 = vsyncadd (%p996_p3), %s200_s27, 4294967168  ;;  %p997_p13 = scmp.ne.s32.totalorder %s985_s20, 0 }
  0x59   : > { %697 = dma.done.wait (%p997_p13), [#allocation6], 1024  }
  0x5a   : > { %699 = vsyncadd (%p997_p13), [#allocation6], 4294966272  ;;  %v732_v0 = vmov 0.0|0.0   ;;  %vm733_vm0 = vmmov 0   ;;  %v734_v1 = vmov 0.0   ;;  %v237_v2 = vld [vmem:[#allocation5] sm:$0xff] }
  0x5b   : > { %492 = vmatprep.subr.bf16.mxu0 %v732_v0  ;;  %489 = vmatprep.mubr.msk.f32.mxu0 %vm733_vm0, %v734_v1  ;;  %v238_v3 = vld [vmem:[#allocation5 + $0x8] sm:$0xff]  ;;  %v239_v4 = vld [vmem:[#allocation5 + $0x10] sm:$0xff]  ;;  %v240_v6 = vld [vmem:[#allocation5 + $0x18] sm:$0xff]  ;;  %vm252_vm1 = vcmask 523264   ;;  %s461_s24 = sshll.u32 %s718_s15, 7  ;;  %s232_s9 = scalar_lea.vmem [#allocation7], %s455_s25 }
  0x5c   : > { %v493_v5 = vpack.c.bf16 %v238_v3, %v237_v2  ;;  %v496_v7 = vpack.c.bf16 %v240_v6, %v239_v4  ;;  %v241_v8 = vld [vmem:[#allocation5 + $0x20] sm:$0xff]  ;;  %v242_v9 = vld [vmem:[#allocation5 + $0x28] sm:$0xff]  ;;  %v243_v11 = vld [vmem:[#allocation5 + $0x30] sm:$0xff]  ;;  %s343_s10 = sshll.u32 %s232_s9, 4  ;;  %s928_s29 = scalar_lea.hbm %s980_s3, %s461_s24  ;;  %s930_s10 = int_to_ptr.vmem [resolvable:$true] %s343_s10 }
  0x5d   : > { %v499_v10 = vpack.c.bf16 %v242_v9, %v241_v8  ;;  %v244_v12 = vld [vmem:[#allocation5 + $0x38] sm:$0xff]  ;;  %v458_v15 = vld [vmem:[%s979_s2] ss:$0 sm:$0xff]  ;;  %s329_s6 = scalar_lea.sflag [#allocation4], %s905_s19  ;;  %s640_s26 = scalar_lea.vmem %s930_s10, 128 }
  0x5e   : > { %494 = vmatpush3.bf16.msra.mxu0 %v493_v5  ;;  %v502_v13 = vpack.c.bf16 %v244_v12, %v243_v11  ;;  %v236_v14 = vld [vmem:[%s203_s4] sm:$0xff]  ;;  %p641_p4 = scmp.ne.s32.totalorder %s930_s10, %s640_s26  ;;  %s735_s15 = smov [#allocation7]  }
  0x5f   : > { %495 = vmatprep.subr.bf16.mxu0 %v732_v0  ;;  %s644_s7 = sshll.u32 %s735_s15, 4  ;;  %s645_s7 = int_to_ptr.vmem [resolvable:$false] %s644_s7 }
  0x60   : > { %p642_p6 = pnand %p641_p4, %p852_p10  ;;  %s646_s8 = scalar_lea.vmem %s645_s7, 256 }
  0x61   : > { %p647_p12 = scmp.lt.s32.totalorder %s930_s10, %s645_s7  ;;  %p648_p11 = scmp.lt.s32.totalorder %s646_s8, %s640_s26 }
  0x62   : > { %497 = vmatpush3.bf16.msra.mxu0 %v496_v7  ;;  %p643_p8 = pneg %p642_p6 }
  0x63   : > { %498 = vmatprep.subr.bf16.mxu0 %v732_v0  ;;  %p649_p0 = por %p648_p11, %p647_p12 }
  0x65   : > { %p650_p5 = pnand %p649_p0, %p643_p8 }
  0x66   : > { %500 = vmatpush3.bf16.msra.mxu0 %v499_v10 }
  0x67   : > { %501 = vmatprep.subr.bf16.mxu0 %v732_v0 }
  0x6a   : > { %503 = vmatpush3.bf16.msra.mxu0 %v502_v13 }
  0x6d   : > { %490 = vmatmul.mubr.msk.f32.vlgmr.msra.gmra.mrb[0].mxu0 %vm252_vm1, %v236_v14 }
 0x140   : > { %v322_v16 = vpop.f32.mrb[0].mxu0 }
 0x141   : > { %v323_v17 = vadd.f32 %v458_v15, %v322_v16  ;;  %v491_v18 = vpop.f32.mrb[1].mxu0 }
 0x143   : > { %v326_v19 = vmax.f32 %v323_v17, 0.0 }
 0x145   : > { %327 = vst [vmem:[%s232_s9] sm:$0xff] %v326_v19 }
 0x146   : > { %653 = shalt.err (!%p650_p5)
}
 0x147   : > { %s654_s21 = scalar_lea.hbm %s928_s29, 128  ;;  %s658_s27 = scalar_lea.hbm %s980_s3, 256 }
 0x148   : > { %p655_p9 = scmp.ne.s32.totalorder %s928_s29, %s654_s21  ;;  %p659_p7 = scmp.lt.u32.totalorder %s928_s29, %s980_s3 }
 0x149   : > { %p660_p3 = scmp.lt.u32.totalorder %s658_s27, %s654_s21  ;;  %p662_p4 = scmp.lt.u32.totalorder %s654_s21, %s928_s29 }
 0x14a   : > { %p656_p1 = pnand %p655_p9, %p852_p10 }
 0x14b   : > { %p661_p13 = por %p660_p3, %p659_p7 }
 0x14c   : > { %p657_p2 = pneg %p656_p1 }
 0x14d   : > { %p663_p6 = por %p662_p4, %p661_p13 }
 0x14f   : > { %p664_p8 = pnand %p663_p6, %p657_p2 }
 0x151   : > { %667 = shalt.err (!%p664_p8)
}
 0x152   : > { %510 = dma.vmem_to_hbm [thread:$0]  (%p852_p10), %s930_s10, 128, %s928_s29, %s329_s6  }
 0x153 PF: > { %s355_s22 = sand.u32 1, %s706_s12   ;;  %p998_p12 = scmp.ne.s32.totalorder %s988_s23, 0 }
 0x154   : > { %p999_p11 = scmp.ge.s32.totalorder %s726_s17, 2  ;;  %s356_s24 = scalar_lea.sflag [#allocation4], %s355_s22 }
 0x156   : > { %p521_p0 = pnand %p999_p11, %p998_p12 }
 0x158   : > { %701 = dma.done.wait (!%p521_p0), %s356_s24, 128  }
 0x159   : > { %703 = vsyncadd (!%p521_p0), %s356_s24, 4294967168  ;;  %s20_s17 = sadd.s32 1, %s726_s17   ;;  %s1000_s12 = smov %s710_s13 }
 0x15a   : > { %p17_p5 = scmp.ge.s32.totalorder %s20_s17, 4   ;;  %s1001_s13 = smov %s714_s14 }
 0x15b   : > { %s1002_s14 = smov %s861_s5  ;;  %s1003_s15 = smov %s722_s16 }
 0x15c   : > { %s1004_s16 = smov %s1006_s28  ;;  %19 = sbr.rel (!%p17_p5) target bundleno = 7 (0x7), region = 85 }
 0x163   :  { %361 = vsyncpa [#allocation3], 1 }
 0x164   :  { %363 = vsyncpa [#allocation3 + $0x1], 1 }
 0x165   :  { %364 = vsyncpa [#allocation6], 1 }
 0x166   :  { %365 = vsyncpa [#allocation4], 1 }
 0x167   :  { %367 = vsyncpa [#allocation4 + $0x1], 1 }

// kernel: tpu_custom_call.1
= control target key start
LH: loop header
LB: loop body
LE: loop exit
PB: predicated region body
PF: predicated region fallthrough
CT: control target
= control target key end

     0   :  { %8 = vsyncpa [#allocation3], 0  ;;  %s977_s0 = inlined_call_operand.hbm [shape: f32[16,64], index: 0, kind: input, shape index: {}]   ;;  %s978_s1 = inlined_call_operand.hbm [shape: f32[64,128], index: 1, kind: input, shape index: {}]   ;;  %s979_s2 = inlined_call_operand.vmem [shape: f32[1,128], index: 2, kind: input, shape index: {}]   ;;  %s980_s3 = inlined_call_operand.hbm [shape: f32[16,128], index: 3, kind: output, shape index: {}]  }
   0x1   :  { %10 = vsyncpa [#allocation3 + $0x1], 0 }
   0x2   :  { %11 = vsyncpa [#allocation6], 0 }
   0x3   :  { %12 = vsyncpa [#allocation4], 0 }
   0x4   :  { %14 = vsyncpa [#allocation4 + $0x1], 0  ;;  %s756_s12 = smov 0   ;;  %s758_s13 = smov 0  }
   0x5   :  { %s760_s14 = smov 0   ;;  %s762_s15 = smov 0  }
   0x6   :  { %s764_s16 = smov 0   ;;  %s766_s17 = smov 0  }
   0x7 LB: > { %s446_s18 = sadd.s32 4294967295, %s726_s17   ;;  %s447_s19 = sadd.s32 4294967294, %s726_s17   ;;  %s726_s17 = sphi %s766_s17, %s20_s17   ;;  %s722_s16 = sphi %s764_s16, %s1004_s16   ;;  %s718_s15 = sphi %s762_s15, %s1003_s15   ;;  %s714_s14 = sphi %s760_s14, %s1002_s14   ;;  %s710_s13 = sphi %s758_s13, %s1001_s13   ;;  %s706_s12 = sphi %s756_s12, %s1000_s12  }
   0x8   : > { %p52_p0 = scmp.ne.s32.totalorder %s710_s13, %s706_s12  ;;  %p790_p1 = scmp.eq.s32.totalorder %s446_s18, 0 }
   0x9   : > { %p794_p2 = scmp.eq.s32.totalorder %s446_s18, 1  ;;  %p136_p3 = scmp.eq.s32.totalorder %s447_s19, 1 }
   0xa   : > { %s985_s20 = scalar_select %p790_p1, 1, 0 }
   0xb   : > { %s986_s21 = scalar_select %p794_p2, 1, 0 }
   0xc   : > { %p800_p4 = por %p790_p1, %p52_p0  ;;  %p448_p5 = scmp.ge.s32.totalorder %s726_s17, 1 }
   0xd   : > { %p805_p6 = por %p136_p3, %p52_p0  ;;  %p143_p7 = scmp.lt.s32.totalorder %s726_s17, 3 }
   0xe   : > { %s987_s22 = scalar_select %p800_p4, 1, 0 }
   0xf   : > { %s988_s23 = scalar_select %p805_p6, 1, 0 }
  0x10   : > { %p810_p8 = pnand %p448_p5, %p143_p7  ;;  %s728_s25 = smov [#allocation5]  }
  0x11   : > { %s157_s26 = sshll.u32 %s728_s25, 4  ;;  %s32_s28 = sadd.s32 1, %s722_s16  ;;  %s158_s26 = int_to_ptr.vmem [resolvable:$true] %s157_s26 }
  0x12   : > { %s989_s24 = scalar_select %p810_p8, 1, 0 }
  0x13   : > { %p512_p9 = pneg %p810_p8  ;;  %s582_s4 = scalar_lea.hbm %s978_s1, 1024 }
  0x14   : > { %p583_p12 = scmp.ne.s32.totalorder %s978_s1, %s582_s4  ;;  %p589_p5 = scmp.lt.u32.totalorder %s582_s4, %s978_s1 }
  0x15   : > { %p819_p11 = pnand %p512_p9, %p790_p1 }
  0x17   : > { %p584_p13 = pneg %p819_p11 }
  0x19   : > { %p585_p0 = pnand %p584_p13, %p583_p12 }
  0x1b   : > { %p586_p3 = pneg %p585_p0 }
  0x1d   : > { %p591_p7 = pnand %p589_p5, %p586_p3 }
  0x1f   : > { %594 = shalt.err (!%p591_p7)
}
  0x20   : > { %s595_s9 = scalar_lea.vmem %s158_s26, 1024  ;;  %p603_p1 = scmp.lt.s32.totalorder %s158_s26, %s158_s26 }
  0x21   : > { %p596_p9 = scmp.ne.s32.totalorder %s158_s26, %s595_s9  ;;  %p604_p4 = scmp.lt.s32.totalorder %s595_s9, %s595_s9 }
  0x23   : > { %p598_p10 = pnand %p596_p9, %p584_p13  ;;  %p605_p8 = por %p604_p4, %p603_p1 }
  0x25   : > { %p599_p6 = pneg %p598_p10 }
  0x27   : > { %p606_p2 = pnand %p605_p8, %p599_p6 }
  0x29   : > { %609 = shalt.err (!%p606_p2)
}
  0x2a   : > { %s729_s10 = smov 128   ;;  %s730_s11 = smov 8  }
  0x2b   : > { %515 = dma.hbm_to_vmem [thread:$0]  (!%p819_p11), %s978_s1, 1024, %s158_s26, [#allocation6], %s729_s10, %s729_s10, %s730_s11  }
  0x2c   : > { %p34_p1 = scmp.ge.s32.totalorder %s32_s28, 2  ;;  %s39_s25 = sadd.s32 1, %s714_s14 }
  0x2d   : > { %p46_p2 = scmp.ne.s32.totalorder %s714_s14, %s710_s13  ;;  %p47_p4 = scmp.eq.s32.totalorder %s726_s17, 0 }
  0x2e   : > { %s1006_s28 = smov (%p34_p1, %s32_s28), 0  ;;  %p992_p8 = scmp.ne.s32.totalorder %s986_s21, 0 }
  0x2f   : > { %p846_p6 = por %p47_p4, %p46_p2  ;;  %s36_s27 = ssub.s32 %s722_s16, %s1006_s28 }
  0x30   : > { %p852_p10 = por %p992_p8, %p46_p2  ;;  %p525_p12 = scmp.lt.s32.totalorder %s726_s17, 2 }
  0x31   : > { %p37_p11 = scmp.eq.s32.totalorder %s36_s27, 0  ;;  %s177_s26 = sand.u32 1, %s714_s14  }
  0x32   : > { %s452_s4 = sshll.u32 %s177_s26, 3  ;;  %s453_s6 = sshll.u32 %s722_s16, 7 }
  0x33   : > { %s861_s5 = scalar_select %p37_p11, %s714_s14, %s39_s25  }
  0x34   : > { %s867_s9 = scalar_lea.hbm %s977_s0, %s453_s6  ;;  %s181_s21 = scalar_lea.vmem [#allocation2], %s452_s4 }
  0x35   : > { %s188_s10 = sshll.u32 %s181_s21, 4  ;;  %p873_p13 = pnand %p525_p12, %p846_p6  ;;  %s869_s10 = int_to_ptr.vmem [resolvable:$true] %s188_s10 }
  0x36   : > { %s178_s18 = scalar_lea.sflag [#allocation3], %s177_s26  ;;  %s610_s19 = scalar_lea.hbm %s867_s9, 128 }
  0x37   : > { %p611_p0 = scmp.ne.s32.totalorder %s867_s9, %s610_s19  ;;  %p612_p3 = pneg %p873_p13 }
  0x38   : > { %s615_s4 = scalar_lea.hbm %s977_s0, 256  ;;  %p616_p9 = scmp.lt.u32.totalorder %s867_s9, %s977_s0 }
  0x39   : > { %p613_p5 = pnand %p612_p3, %p611_p0  ;;  %p617_p1 = scmp.lt.u32.totalorder %s615_s4, %s610_s19 }
  0x3a   : > { %p619_p4 = scmp.lt.u32.totalorder %s610_s19, %s867_s9 }
  0x3b   : > { %p614_p7 = pneg %p613_p5  ;;  %p618_p2 = por %p617_p1, %p616_p9 }
  0x3d   : > { %p620_p6 = por %p619_p4, %p618_p2 }
  0x3f   : > { %p621_p8 = pnand %p620_p6, %p614_p7 }
  0x41   : > { %624 = shalt.err (!%p621_p8)
}
  0x42   : > { %s625_s26 = scalar_lea.vmem %s869_s10, 128  ;;  %s731_s7 = smov [#allocation2]  }
  0x43   : > { %p626_p12 = scmp.ne.s32.totalorder %s869_s10, %s625_s26  ;;  %s630_s8 = sshll.u32 %s731_s7, 4  ;;  %s631_s8 = int_to_ptr.vmem [resolvable:$false] %s630_s8 }
  0x44   : > { %s632_s21 = scalar_lea.vmem %s631_s8, 256  ;;  %p633_p5 = scmp.lt.s32.totalorder %s869_s10, %s631_s8 }
  0x45   : > { %p628_p11 = pnand %p626_p12, %p612_p3  ;;  %p634_p9 = scmp.lt.s32.totalorder %s632_s21, %s625_s26 }
  0x47   : > { %p629_p0 = pneg %p628_p11  ;;  %p635_p1 = por %p634_p9, %p633_p5 }
  0x49   : > { %p636_p2 = pnand %p635_p1, %p629_p0 }
  0x4b   : > { %639 = shalt.err (!%p636_p2)
}
  0x4c   : > { %519 = dma.hbm_to_vmem [thread:$0]  (!%p873_p13), %s867_s9, 128, %s869_s10, %s178_s18  }
  0x4d   : > { %p995_p7 = scmp.ne.s32.totalorder %s989_s24, 0 }
  0x4e   : > { %s905_s19 = sand.u32 (!%p995_p7), 1, %s710_s13   ;;  %p996_p3 = scmp.ne.s32.totalorder (!%p995_p7), %s987_s22, 0 }
  0x4f   : > { %197 = sbr.rel (%p995_p7) target bundleno = 339 (0x153), region = 32  ;;  %s455_s25 = sshll.u32 (!%p995_p7), %s905_s19, 3 }
  0x50   : > { %s200_s27 = scalar_lea.sflag (!%p995_p7), [#allocation3], %s905_s19  ;;  %s203_s4 = scalar_lea.vmem (!%p995_p7), [#allocation2], %s455_s25 }
  0x56   : > { %693 = dma.done.wait (%p996_p3), %s200_s27, 128  }
  0x57   : > { %695 = vsyncadd (%p996_p3), %s200_s27, 4294967168  ;;  %p997_p13 = scmp.ne.s32.totalorder %s985_s20, 0 }
  0x59   : > { %697 = dma.done.wait (%p997_p13), [#allocation6], 1024  }
  0x5a   : > { %699 = vsyncadd (%p997_p13), [#allocation6], 4294966272  ;;  %v732_v0 = vmov 0.0|0.0   ;;  %vm733_vm0 = vmmov 0   ;;  %v734_v1 = vmov 0.0   ;;  %v237_v2 = vld [vmem:[#allocation5] sm:$0xff] }
  0x5b   : > { %492 = vmatprep.subr.bf16.mxu0 %v732_v0  ;;  %489 = vmatprep.mubr.msk.f32.mxu0 %vm733_vm0, %v734_v1  ;;  %v238_v3 = vld [vmem:[#allocation5 + $0x8] sm:$0xff]  ;;  %v239_v4 = vld [vmem:[#allocation5 + $0x10] sm:$0xff]  ;;  %v240_v6 = vld [vmem:[#allocation5 + $0x18] sm:$0xff]  ;;  %vm252_vm1 = vcmask 523264   ;;  %s461_s24 = sshll.u32 %s718_s15, 7  ;;  %s232_s9 = scalar_lea.vmem [#allocation7], %s455_s25 }
  0x5c   : > { %v493_v5 = vpack.c.bf16 %v238_v3, %v237_v2  ;;  %v496_v7 = vpack.c.bf16 %v240_v6, %v239_v4  ;;  %v241_v8 = vld [vmem:[#allocation5 + $0x20] sm:$0xff]  ;;  %v242_v9 = vld [vmem:[#allocation5 + $0x28] sm:$0xff]  ;;  %v243_v11 = vld [vmem:[#allocation5 + $0x30] sm:$0xff]  ;;  %s343_s10 = sshll.u32 %s232_s9, 4  ;;  %s928_s29 = scalar_lea.hbm %s980_s3, %s461_s24  ;;  %s930_s10 = int_to_ptr.vmem [resolvable:$true] %s343_s10 }
  0x5d   : > { %v499_v10 = vpack.c.bf16 %v242_v9, %v241_v8  ;;  %v244_v12 = vld [vmem:[#allocation5 + $0x38] sm:$0xff]  ;;  %v458_v15 = vld [vmem:[%s979_s2] ss:$0 sm:$0xff]  ;;  %s329_s6 = scalar_lea.sflag [#allocation4], %s905_s19  ;;  %s640_s26 = scalar_lea.vmem %s930_s10, 128 }
  0x5e   : > { %494 = vmatpush3.bf16.msra.mxu0 %v493_v5  ;;  %v502_v13 = vpack.c.bf16 %v244_v12, %v243_v11  ;;  %v236_v14 = vld [vmem:[%s203_s4] sm:$0xff]  ;;  %p641_p4 = scmp.ne.s32.totalorder %s930_s10, %s640_s26  ;;  %s735_s15 = smov [#allocation7]  }
  0x5f   : > { %495 = vmatprep.subr.bf16.mxu0 %v732_v0  ;;  %s644_s7 = sshll.u32 %s735_s15, 4  ;;  %s645_s7 = int_to_ptr.vmem [resolvable:$false] %s644_s7 }
  0x60   : > { %p642_p6 = pnand %p641_p4, %p852_p10  ;;  %s646_s8 = scalar_lea.vmem %s645_s7, 256 }
  0x61   : > { %p647_p12 = scmp.lt.s32.totalorder %s930_s10, %s645_s7  ;;  %p648_p11 = scmp.lt.s32.totalorder %s646_s8, %s640_s26 }
  0x62   : > { %497 = vmatpush3.bf16.msra.mxu0 %v496_v7  ;;  %p643_p8 = pneg %p642_p6 }
  0x63   : > { %498 = vmatprep.subr.bf16.mxu0 %v732_v0  ;;  %p649_p0 = por %p648_p11, %p647_p12 }
  0x65   : > { %p650_p5 = pnand %p649_p0, %p643_p8 }
  0x66   : > { %500 = vmatpush3.bf16.msra.mxu0 %v499_v10 }
  0x67   : > { %501 = vmatprep.subr.bf16.mxu0 %v732_v0 }
  0x6a   : > { %503 = vmatpush3.bf16.msra.mxu0 %v502_v13 }
  0x6d   : > { %490 = vmatmul.mubr.msk.f32.vlgmr.msra.gmra.mrb[0].mxu0 %vm252_vm1, %v236_v14 }
 0x140   : > { %v322_v16 = vpop.f32.mrb[0].mxu0 }
 0x141   : > { %v323_v17 = vadd.f32 %v458_v15, %v322_v16  ;;  %v491_v18 = vpop.f32.mrb[1].mxu0 }
 0x143   : > { %v326_v19 = vmax.f32 %v323_v17, 0.0 }
 0x145   : > { %327 = vst [vmem:[%s232_s9] sm:$0xff] %v326_v19 }
 0x146   : > { %653 = shalt.err (!%p650_p5)
}
 0x147   : > { %s654_s21 = scalar_lea.hbm %s928_s29, 128  ;;  %s658_s27 = scalar_lea.hbm %s980_s3, 256 }
 0x148   : > { %p655_p9 = scmp.ne.s32.totalorder %s928_s29, %s654_s21  ;;  %p659_p7 = scmp.lt.u32.totalorder %s928_s29, %s980_s3 }
 0x149   : > { %p660_p3 = scmp.lt.u32.totalorder %s658_s27, %s654_s21  ;;  %p662_p4 = scmp.lt.u32.totalorder %s654_s21, %s928_s29 }
 0x14a   : > { %p656_p1 = pnand %p655_p9, %p852_p10 }
 0x14b   : > { %p661_p13 = por %p660_p3, %p659_p7 }
 0x14c   : > { %p657_p2 = pneg %p656_p1 }
 0x14d   : > { %p663_p6 = por %p662_p4, %p661_p13 }
 0x14f   : > { %p664_p8 = pnand %p663_p6, %p657_p2 }
 0x151   : > { %667 = shalt.err (!%p664_p8)
}
 0x152   : > { %510 = dma.vmem_to_hbm [thread:$0]  (%p852_p10), %s930_s10, 128, %s928_s29, %s329_s6  }
 0x153 PF: > { %s355_s22 = sand.u32 1, %s706_s12   ;;  %p998_p12 = scmp.ne.s32.totalorder %s988_s23, 0 }
 0x154   : > { %p999_p11 = scmp.ge.s32.totalorder %s726_s17, 2  ;;  %s356_s24 = scalar_lea.sflag [#allocation4], %s355_s22 }
 0x156   : > { %p521_p0 = pnand %p999_p11, %p998_p12 }
 0x158   : > { %701 = dma.done.wait (!%p521_p0), %s356_s24, 128  }
 0x159   : > { %703 = vsyncadd (!%p521_p0), %s356_s24, 4294967168  ;;  %s20_s17 = sadd.s32 1, %s726_s17   ;;  %s1000_s12 = smov %s710_s13 }
 0x15a   : > { %p17_p5 = scmp.ge.s32.totalorder %s20_s17, 4   ;;  %s1001_s13 = smov %s714_s14 }
 0x15b   : > { %s1002_s14 = smov %s861_s5  ;;  %s1003_s15 = smov %s722_s16 }
 0x15c   : > { %s1004_s16 = smov %s1006_s28  ;;  %19 = sbr.rel (!%p17_p5) target bundleno = 7 (0x7), region = 85 }
 0x163   :  { %361 = vsyncpa [#allocation3], 1 }
 0x164   :  { %363 = vsyncpa [#allocation3 + $0x1], 1 }
 0x165   :  { %364 = vsyncpa [#allocation6], 1 }
 0x166   :  { %365 = vsyncpa [#allocation4], 1 }
 0x167   :  { %367 = vsyncpa [#allocation4 + $0x1], 1 }

</bundles_post_ra>
